<compile_context>
chip_gen: v7x
topology: tpu7x:2x2x1
jax: 0.10.0
libtpu: 0.0.40
codegen_flags: <defaults>
</compile_context>

<pallas_src>
from functools import partial

import jax
import jax.numpy as jnp
from jax.experimental import pallas as pl
from jax.experimental.pallas import tpu as pltpu


def _three_part_kernel(x_ref, wcl_ref, bcl_ref, wy_ref, by_ref, out_ref, acc_ref,
                       *, c_num, hard_cbm, wcl_k_slice):
    """acc += x_tile @ [wc|wl]; on last K step: sigmoid mask, head matmul, store."""
    k = pl.program_id(1)

    @pl.when(k == 0)
    def _():
        acc_ref[...] = jnp.zeros_like(acc_ref)

    if wcl_k_slice is None:
        w = wcl_ref[...]                                     # block already K-sized
    else:
        # Fused weight resident in VMEM: slice the current K window out of it.
        start = pl.multiple_of(k * wcl_k_slice, wcl_k_slice)
        w = wcl_ref[pl.ds(start, wcl_k_slice), :]

    # Single fused x-projection on the MXU; x cast to bf16 in-kernel (cheap VPU op,
    # avoids a separate wrapper-side cast pass over x in HBM), f32 accumulation.
    acc_ref[...] += jnp.dot(x_ref[...].astype(w.dtype), w,
                            preferred_element_type=jnp.float32)

    @pl.when(k == pl.num_programs(1) - 1)
    def _():
        z = acc_ref[...] + bcl_ref[...]                       # [TB, c_num+l_num] f32
        lane = jax.lax.broadcasted_iota(jnp.int32, z.shape, 1)
        is_concept = lane < c_num
        cl = jnp.where(is_concept, jax.nn.sigmoid(z), z)      # soft concepts | latents
        if hard_cbm:
            # round(sigmoid(z)) computed directly from the logit: (z > 0).
            cl_y = jnp.where(is_concept, (z > 0).astype(jnp.float32), z)
        else:
            cl_y = cl
        # Single fused head matmul (tiny K/N, kept in f32).
        y = jnp.dot(cl_y, wy_ref[...], preferred_element_type=jnp.float32) + by_ref[...]
        cl_dim = cl.shape[-1]
        out_ref[:, :cl_dim] = cl
        out_ref[:, cl_dim:] = y


def _physical_vmem_bytes():
    """Per-generation VMEM capacity; conservative 64 MiB (v7x) if query fails."""
    try:
        return int(pltpu.get_tpu_info().vmem_capacity_bytes)
    except Exception:
        return 64 << 20


def _pick_k_tiling(d, tk_budget):
    """Pick (tk, nk, d_pad): K tile, #K steps, padded D (multiple of tk)."""
    tk_budget = max(128, (tk_budget // 128) * 128)
    # Prefer a divisor of D within [budget/2, budget] -> no zero-padding pass over x.
    lo = max(128, (tk_budget // 2 // 128) * 128)
    for tk in range(tk_budget, lo - 1, -128):
        if d % tk == 0:
            return tk, d // tk, d
    nk = -(-d // tk_budget)
    tk = ((-(-d // nk)) + 127) // 128 * 128
    return tk, nk, nk * tk


def prepare_params(params):
    """One-time parameter prep: fuse wc|wl and bc|bl, pre-cast the big weight to bf16."""
    c_num = params["wc"].shape[1]
    return {
        "wcl": jnp.concatenate([params["wc"], params["wl"]], axis=1).astype(jnp.bfloat16),
        "bcl": jnp.concatenate([params["bc"], params["bl"]], axis=1).astype(jnp.float32),
        "wy": params["wy"].astype(jnp.float32),
        "by": params["by"].astype(jnp.float32),
        "c_num": int(c_num),
    }


def three_part_forward(x_nchw, prepared, *, use_latents=True, hard_cbm=False,
                       batch_tile=512):
    """Flatten NCHW input and run the tiled Pallas kernel. Returns (cl_out, y_out)."""
    # TODO(synk): torch's use_latents=False branch concatenates zeros along axis=0
    # (batch), which looks like a bug in the reference; only use_latents=True here.
    assert use_latents, "only the use_latents=True path is implemented"

    wcl, bcl, wy, by = prepared["wcl"], prepared["bcl"], prepared["wy"], prepared["by"]
    c_num = prepared["c_num"]
    B = x_nchw.shape[0]
    D, cl_dim = wcl.shape
    y_num = wy.shape[1]
    out_dim = cl_dim + y_num

    x2d = x_nchw.reshape(B, D)          # native dtype; cast to bf16 inside the kernel
    x_bytes = x2d.dtype.itemsize

    # Per-generation VMEM budget: ~40 MiB on v7x (64 MiB physical), ~80+ MiB on
    # v5e/v6e (128 MiB physical). Also passed as the Mosaic vmem_limit.
    vmem_limit = min(int(_physical_vmem_bytes() * 0.65), 96 << 20)

    # --- batch tiling -------------------------------------------------------
    tb = B if B <= batch_tile else batch_tile
    nb = pl.cdiv(B, tb)
    if nb == 1 and B >= 16:
        # v7x megacore: ensure the "parallel" batch axis has >= 2 blocks so both
        # TensorCores get work (no effect on single-TC v5e/v6e).
        tb = max(8, (pl.cdiv(B, 2) + 7) // 8 * 8)
        nb = pl.cdiv(B, tb)

    # --- K (reduction over D) tiling ---------------------------------------
    # Fast path: whole reduction in one step if double-buffered x block plus the
    # lane-padded resident weight fit comfortably in the budget.
    fast_bytes = 2 * tb * D * x_bytes + 2 * D * 128 * 2 + 4 * tb * 128 * 4
    if fast_bytes <= int(0.8 * vmem_limit):
        tk, nk, d_pad = D, 1, D
    else:
        tk_budget = int(0.6 * vmem_limit) // (2 * tb * x_bytes)
        tk, nk, d_pad = _pick_k_tiling(D, tk_budget)

    # Keep the fused weight fully VMEM-resident across all batch blocks when its
    # lane-padded footprint (d_pad x 128 lanes x bf16, double-counted) is small --
    # avoids re-streaming all of wcl from HBM for every batch block.
    wcl_resident = (nk > 1) and (2 * d_pad * 128 * 2) <= int(0.25 * vmem_limit)

    if d_pad != D:
        # Awkward D: zero-pad the reduction dim (zeros contribute nothing to the dot)
        # instead of a degenerate tk=D block that could exceed VMEM on v7x.
        x2d = jnp.pad(x2d, ((0, 0), (0, d_pad - D)))
        wcl = jnp.pad(wcl, ((0, d_pad - D), (0, 0)))

    if wcl_resident or nk == 1:
        wcl_spec = pl.BlockSpec((d_pad, cl_dim), lambda i, k: (0, 0))
        wcl_k_slice = tk if nk > 1 else None
    else:
        wcl_spec = pl.BlockSpec((tk, cl_dim), lambda i, k: (k, 0))
        wcl_k_slice = None

    cost = pl.CostEstimate(
        flops=2 * B * D * cl_dim + 2 * B * cl_dim * y_num,
        transcendentals=B * c_num,
        bytes_accessed=B * d_pad * x_bytes + d_pad * cl_dim * 2 + B * out_dim * 4,
    )

    packed = pl.pallas_call(
        partial(_three_part_kernel, c_num=c_num, hard_cbm=hard_cbm,
                wcl_k_slice=wcl_k_slice),
        out_shape=jax.ShapeDtypeStruct((B, out_dim), jnp.float32),
        grid_spec=pltpu.PrefetchScalarGridSpec(
            num_scalar_prefetch=0,
            grid=(nb, nk),
            in_specs=[
                pl.BlockSpec((tb, tk), lambda i, k: (i, k)),          # x tiles (native dtype)
                wcl_spec,                                             # fused wc|wl (bf16)
                pl.BlockSpec((1, cl_dim), lambda i, k: (0, 0)),       # fused bc|bl
                pl.BlockSpec((cl_dim, y_num), lambda i, k: (0, 0)),   # wy (resident)
                pl.BlockSpec((1, y_num), lambda i, k: (0, 0)),        # by (resident)
            ],
            out_specs=pl.BlockSpec((tb, out_dim), lambda i, k: (i, 0)),
            scratch_shapes=[pltpu.VMEM((tb, cl_dim), jnp.float32)],   # f32 accumulator
        ),
        compiler_params=pltpu.CompilerParams(
            dimension_semantics=("parallel", "arbitrary"),
            vmem_limit_bytes=vmem_limit,
        ),
        cost_estimate=cost,
    )(x2d, wcl, bcl, wy, by)

    return packed[:, :cl_dim], packed[:, cl_dim:]


def init_params(key, d_in, c_num, l_num, y_num):
    ks = jax.random.split(key, 6)
    scale_in = 1.0 / jnp.sqrt(jnp.float32(d_in))
    scale_cl = 1.0 / jnp.sqrt(jnp.float32(c_num + l_num))
    return {
        "wc": jax.random.normal(ks[0], (d_in, c_num), jnp.float32) * scale_in,
        "bc": jax.random.normal(ks[1], (1, c_num), jnp.float32) * 0.01,
        "wl": jax.random.normal(ks[2], (d_in, l_num), jnp.float32) * scale_in,
        "bl": jax.random.normal(ks[3], (1, l_num), jnp.float32) * 0.01,
        "wy": jax.random.normal(ks[4], (c_num + l_num, y_num), jnp.float32) * scale_cl,
        "by": jax.random.normal(ks[5], (1, y_num), jnp.float32) * 0.01,
    }


def reference_forward(x_nchw, params, *, hard_cbm=False):
    """Plain-JAX reference using the same bf16 quantization of x / fused weight."""
    wc, bc, wl, bl, wy, by = (params[k] for k in ("wc", "bc", "wl", "bl", "wy", "by"))
    B = x_nchw.shape[0]
    c_num = wc.shape[1]
    x2d = x_nchw.reshape(B, -1).astype(jnp.bfloat16).astype(jnp.float32)
    wcl = jnp.concatenate([wc, wl], axis=1).astype(jnp.bfloat16).astype(jnp.float32)
    z = x2d @ wcl + jnp.concatenate([bc, bl], axis=1)
    c = jax.nn.sigmoid(z[:, :c_num])
    l = z[:, c_num:]
    cl = jnp.concatenate([c, l], axis=1)
    if hard_cbm:
        # == torch.round(sigmoid(z)) away from the measure-zero tie z == 0.
        cl_y = jnp.concatenate([(z[:, :c_num] > 0).astype(jnp.float32), l], axis=1)
    else:
        cl_y = cl
    y = cl_y @ wy + by
    return cl, y


if __name__ == "__main__":
    key = jax.random.PRNGKey(0)
    kx, kp = jax.random.split(key)

    # Small shapes: batch=2, channels=4, spatial=16x16 -> D_in=1024
    B, C, H, W = 2, 4, 16, 16
    c_num, l_num, y_num = 8, 8, 4

    x = jax.random.normal(kx, (B, C, H, W), jnp.float32)
    params = init_params(kp, C * H * W, c_num, l_num, y_num)
    prepared = prepare_params(params)   # fuse + bf16-cast once, not per forward call

    # Soft (default) path.
    cl_out, y_out = three_part_forward(x, prepared, use_latents=True, hard_cbm=False)
    jax.block_until_ready((cl_out, y_out))
    cl_ref, y_ref = reference_forward(x, params, hard_cbm=False)
    assert cl_out.shape == (B, c_num + l_num) and y_out.shape == (B, y_num)
    assert jnp.allclose(cl_out, cl_ref, atol=2e-3, rtol=2e-3)
    assert jnp.allclose(y_out, y_ref, atol=2e-3, rtol=2e-3)

    # Hard-CBM path.
    cl_h, y_h = three_part_forward(x, prepared, use_latents=True, hard_cbm=True)
    jax.block_until_ready((cl_h, y_h))
    cl_hr, y_hr = reference_forward(x, params, hard_cbm=True)
    assert jnp.allclose(cl_h, cl_hr, atol=2e-3, rtol=2e-3)
    # y on the hard path hinges on an exact 0/1 threshold; only compare when no
    # concept logit sits near the tie (bf16 accumulation order could flip a tie).
    zc = (x.reshape(B, -1).astype(jnp.bfloat16).astype(jnp.float32)
          @ params["wc"].astype(jnp.bfloat16).astype(jnp.float32) + params["bc"])
    if float(jnp.min(jnp.abs(zc))) > 1e-3:
        assert jnp.allclose(y_h, y_hr, atol=2e-3, rtol=2e-3)

    print("KERNEL_OK")
</pallas_src>

<mosaic_0001>
module attributes {stable_mosaic.version = 11 : i64} {
  func.func @_three_part_kernel(%arg0: i32, %arg1: i32, %arg2: memref<2x1024xf32, #tpu.memory_space<vmem>>, %arg3: memref<1024x16xbf16, #tpu.memory_space<vmem>>, %arg4: memref<1x16xf32, #tpu.memory_space<vmem>>, %arg5: memref<16x4xf32, #tpu.memory_space<vmem>>, %arg6: memref<1x4xf32, #tpu.memory_space<vmem>>, %arg7: memref<2x20xf32, #tpu.memory_space<vmem>>, %arg8: memref<2x16xf32, #tpu.memory_space<vmem>>) attributes {dimension_semantics = [#tpu.dimension_semantics<parallel>, #tpu.dimension_semantics<arbitrary>], iteration_bounds = array<i64: 1, 1>, scalar_prefetch = 0 : i64, scratch_operands = 1 : i64, tpu.core_type = #tpu.core_type<tc>, window_params = [{transform_indices = @transform_0, window_bounds = array<i64: 2, 1024>}, {pipeline_mode = #tpu.pipeline_mode<synchronous>, transform_indices = @transform_1, window_bounds = array<i64: 1024, 16>}, {pipeline_mode = #tpu.pipeline_mode<synchronous>, transform_indices = @transform_2, window_bounds = array<i64: 1, 16>}, {pipeline_mode = #tpu.pipeline_mode<synchronous>, transform_indices = @transform_3, window_bounds = array<i64: 16, 4>}, {pipeline_mode = #tpu.pipeline_mode<synchronous>, transform_indices = @transform_4, window_bounds = array<i64: 1, 4>}, {transform_indices = @transform_5, window_bounds = array<i64: 2, 20>}]} {
    %c0_i32 = arith.constant 0 : i32
    %0 = arith.cmpi eq, %arg1, %c0_i32 : i32
    %1 = arith.extui %0 : i1 to i32
    %c0_i32_0 = arith.constant 0 : i32
    %2 = arith.cmpi ne, %1, %c0_i32_0 : i32
    scf.if %2 {
      %cst_10 = arith.constant 0.000000e+00 : f32
      %13 = vector.broadcast %cst_10 : f32 to vector<2x16xf32>
      %c0_11 = arith.constant 0 : index
      %c0_12 = arith.constant 0 : index
      %14 = vector.load %arg8[%c0_11, %c0_12] : memref<2x16xf32, #tpu.memory_space<vmem>>, vector<2x16xf32>
      tpu.vector_store %arg8[%c0_11, %c0_12], %13 {strides = array<i32>} : memref<2x16xf32, #tpu.memory_space<vmem>>, vector<2x16xf32>,
    } else {
    }
    %c0 = arith.constant 0 : index
    %c0_1 = arith.constant 0 : index
    %3 = vector.load %arg3[%c0, %c0_1] : memref<1024x16xbf16, #tpu.memory_space<vmem>>, vector<1024x16xbf16>
    %c0_2 = arith.constant 0 : index
    %c0_3 = arith.constant 0 : index
    %4 = vector.load %arg8[%c0_2, %c0_3] : memref<2x16xf32, #tpu.memory_space<vmem>>, vector<2x16xf32>
    %c0_4 = arith.constant 0 : index
    %c0_5 = arith.constant 0 : index
    %5 = vector.load %arg2[%c0_4, %c0_5] : memref<2x1024xf32, #tpu.memory_space<vmem>>, vector<2x1024xf32>
    %6 = arith.truncf %5 : vector<2x1024xf32> to vector<2x1024xbf16>
    %cst = arith.constant dense<0.000000e+00> : vector<2x16xf32>
    %7 = tpu.matmul %6, %3, %cst {dimension_numbers = #tpu.dot_dimension_numbers<[1], [0], [0], [1], [0, 0, 1, 1], [], []>} : vector<2x1024xbf16>, vector<1024x16xbf16>, vector<2x16xf32> -> vector<2x16xf32>
    %8 = arith.addf %4, %7 : vector<2x16xf32>
    %c0_6 = arith.constant 0 : index
    %c0_7 = arith.constant 0 : index
    %9 = vector.load %arg8[%c0_6, %c0_7] : memref<2x16xf32, #tpu.memory_space<vmem>>, vector<2x16xf32>
    tpu.vector_store %arg8[%c0_6, %c0_7], %8 {strides = array<i32>} : memref<2x16xf32, #tpu.memory_space<vmem>>, vector<2x16xf32>,
    %c0_i32_8 = arith.constant 0 : i32
    %10 = arith.cmpi eq, %arg1, %c0_i32_8 : i32
    %11 = arith.extui %10 : i1 to i32
    %c0_i32_9 = arith.constant 0 : i32
    %12 = arith.cmpi ne, %11, %c0_i32_9 : i32
    scf.if %12 {
      %c0_10 = arith.constant 0 : index
      %c0_11 = arith.constant 0 : index
      %13 = vector.load %arg8[%c0_10, %c0_11] : memref<2x16xf32, #tpu.memory_space<vmem>>, vector<2x16xf32>
      %c0_12 = arith.constant 0 : index
      %c0_13 = arith.constant 0 : index
      %14 = vector.load %arg4[%c0_12, %c0_13] : memref<1x16xf32, #tpu.memory_space<vmem>>, vector<1x16xf32>
      %15 = vector.broadcast %14 : vector<1x16xf32> to vector<2x16xf32>
      %16 = arith.addf %13, %15 : vector<2x16xf32>
      %17 = tpu.iota {dimensions = array<i32: 1>} : vector<2x16xi32>
      %c8_i32 = arith.constant 8 : i32
      %18 = vector.broadcast %c8_i32 : i32 to vector<2x16xi32>
      %19 = arith.cmpi slt, %17, %18 : vector<2x16xi32>
      %20 = arith.negf %16 : vector<2x16xf32>
      %21 = math.exp %20 : vector<2x16xf32>
      %cst_14 = arith.constant 1.000000e+00 : f32
      %22 = vector.broadcast %cst_14 : f32 to vector<2x16xf32>
      %23 = arith.addf %22, %21 : vector<2x16xf32>
      %24 = arith.divf %22, %23 : vector<2x16xf32>
      %25 = arith.select %19, %24, %16 : vector<2x16xi1>, vector<2x16xf32>
      %c0_15 = arith.constant 0 : index
      %c0_16 = arith.constant 0 : index
      %26 = vector.load %arg5[%c0_15, %c0_16] : memref<16x4xf32, #tpu.memory_space<vmem>>, vector<16x4xf32>
      %cst_17 = arith.constant dense<0.000000e+00> : vector<2x4xf32>
      %27 = tpu.matmul %25, %26, %cst_17 {dimension_numbers = #tpu.dot_dimension_numbers<[1], [0], [0], [1], [0, 0, 1, 1], [], []>} : vector<2x16xf32>, vector<16x4xf32>, vector<2x4xf32> -> vector<2x4xf32>
      %c0_18 = arith.constant 0 : index
      %c0_19 = arith.constant 0 : index
      %28 = vector.load %arg6[%c0_18, %c0_19] : memref<1x4xf32, #tpu.memory_space<vmem>>, vector<1x4xf32>
      %29 = vector.broadcast %28 : vector<1x4xf32> to vector<2x4xf32>
      %30 = arith.addf %27, %29 : vector<2x4xf32>
      %c0_20 = arith.constant 0 : index
      %c0_21 = arith.constant 0 : index
      %31 = vector.load %arg7[%c0_20, %c0_21] : memref<2x20xf32, #tpu.memory_space<vmem>>, vector<2x16xf32>
      tpu.vector_store %arg7[%c0_20, %c0_21], %25 {strides = array<i32>} : memref<2x20xf32, #tpu.memory_space<vmem>>, vector<2x16xf32>,
      %c0_22 = arith.constant 0 : index
      %c16 = arith.constant 16 : index
      %32 = vector.load %arg7[%c0_22, %c16] : memref<2x20xf32, #tpu.memory_space<vmem>>, vector<2x4xf32>
      tpu.vector_store %arg7[%c0_22, %c16], %30 {strides = array<i32>} : memref<2x20xf32, #tpu.memory_space<vmem>>, vector<2x4xf32>,
    } else {
    }
    return
  }
  func.func @transform_0(%arg0: i32, %arg1: i32) -> (i32, i32) {
    %c0_i32 = arith.constant 0 : i32
    return %arg0, %arg1 : i32, i32
  }
  func.func @transform_1(%arg0: i32, %arg1: i32) -> (i32, i32) {
    %c0_i32 = arith.constant 0 : i32
    %c0_i32_0 = arith.constant 0 : i32
    %c0_i32_1 = arith.constant 0 : i32
    return %c0_i32, %c0_i32_0 : i32, i32
  }
  func.func @transform_2(%arg0: i32, %arg1: i32) -> (i32, i32) {
    %c0_i32 = arith.constant 0 : i32
    %c0_i32_0 = arith.constant 0 : i32
    %c0_i32_1 = arith.constant 0 : i32
    return %c0_i32, %c0_i32_0 : i32, i32
  }
  func.func @transform_3(%arg0: i32, %arg1: i32) -> (i32, i32) {
    %c0_i32 = arith.constant 0 : i32
    %c0_i32_0 = arith.constant 0 : i32
    %c0_i32_1 = arith.constant 0 : i32
    return %c0_i32, %c0_i32_0 : i32, i32
  }
  func.func @transform_4(%arg0: i32, %arg1: i32) -> (i32, i32) {
    %c0_i32 = arith.constant 0 : i32
    %c0_i32_0 = arith.constant 0 : i32
    %c0_i32_1 = arith.constant 0 : i32
    return %c0_i32, %c0_i32_0 : i32, i32
  }
  func.func @transform_5(%arg0: i32, %arg1: i32) -> (i32, i32) {
    %c0_i32 = arith.constant 0 : i32
    %c0_i32_0 = arith.constant 0 : i32
    return %arg0, %c0_i32 : i32, i32
  }
}

</mosaic_0001>

<bundles_post_ra>
// kernel: tpu_custom_call.1
= control target key start
LH: loop header
LB: loop body
LE: loop exit
PB: predicated region body
PF: predicated region fallthrough
CT: control target
= control target key end

     0   :  { %v165_v28 = vlaneseq  ;;  %v1153_v36 = vmov 1983009808   ;;  %s1422_s0 = inlined_call_operand.vmem [shape: f32[2,1024], index: 0, kind: input, shape index: {}]   ;;  %s1423_s1 = inlined_call_operand.vmem [shape: bf16[1024,16], index: 1, kind: input, shape index: {}]   ;;  %s1424_s2 = inlined_call_operand.vmem [shape: f32[1,16], index: 2, kind: input, shape index: {}]   ;;  %s1425_s3 = inlined_call_operand.vmem [shape: f32[16,4], index: 3, kind: input, shape index: {}]   ;;  %s1426_s4 = inlined_call_operand.vmem [shape: f32[1,4], index: 4, kind: input, shape index: {}]   ;;  %s1427_s5 = inlined_call_operand.hbm [shape: f32[2,20], index: 5, kind: output, shape index: {}]  }
   0x1   :  { %v1059_v0 = vld [vmem:[%s1423_s1 + $0x40] sm:$0xff]   ;;  %v1063_v4 = vld [vmem:[%s1423_s1 + $0x48] sm:$0xff]   ;;  %v1067_v8 = vld [vmem:[%s1423_s1 + $0x50] sm:$0xff]   ;;  %v163_v37 = vunpack.c.l.s4 %v1153_v36 }
   0x2   :  { %v1060_v1 = vld [vmem:[%s1423_s1 + $0xc0] sm:$0xff]   ;;  %952 = vmatprep.subr.bf16.mxu0 %v1059_v0  ;;  %v1064_v5 = vld [vmem:[%s1423_s1 + $0xc8] sm:$0xff]   ;;  %v1068_v9 = vld [vmem:[%s1423_s1 + $0xd0] sm:$0xff]   ;;  %v166_v33 = vshrl.u32 %v165_v28, 7 }
   0x3   :  { %v1061_v2 = vld [vmem:[%s1423_s1] sm:$0xff]   ;;  %974 = vmatprep.subr.bf16.mxu1 %v1060_v1  ;;  %v1065_v6 = vld [vmem:[%s1423_s1 + $0x8] sm:$0xff]   ;;  %v1069_v10 = vld [vmem:[%s1423_s1 + $0x10] sm:$0xff]   ;;  %v164_v39 = vunpack.c.0.s8 %v163_v37 }
   0x4   :  { %v1062_v3 = vld [vmem:[%s1423_s1 + $0x80] sm:$0xff]   ;;  %953 = vmatpush3.bf16.msra.mxu0 %v1061_v2  ;;  %v1066_v7 = vld [vmem:[%s1423_s1 + $0x88] sm:$0xff]   ;;  %v1070_v11 = vld [vmem:[%s1423_s1 + $0x90] sm:$0xff]  }
   0x5   :  { %975 = vmatpush3.bf16.msra.mxu1 %v1062_v3  ;;  %954 = vmatprep.subr.bf16.mxu0 %v1063_v4  ;;  %v1071_v12 = vld [vmem:[%s1423_s1 + $0x58] sm:$0xff]   ;;  %v1075_v16 = vld [vmem:[%s1423_s1 + $0x60] sm:$0xff]   ;;  %v1079_v20 = vld [vmem:[%s1423_s1 + $0x68] sm:$0xff]   ;;  %v1295_v41 = vsub.s32 %v164_v39, %v166_v33 }
   0x6   :  { %976 = vmatprep.subr.bf16.mxu1 %v1064_v5  ;;  %v1072_v13 = vld [vmem:[%s1423_s1 + $0xd8] sm:$0xff]   ;;  %v1076_v17 = vld [vmem:[%s1423_s1 + $0xe0] sm:$0xff]   ;;  %v1080_v21 = vld [vmem:[%s1423_s1 + $0xe8] sm:$0xff]  }
   0x7   :  { %v1073_v14 = vld [vmem:[%s1423_s1 + $0x18] sm:$0xff]   ;;  %v1077_v18 = vld [vmem:[%s1423_s1 + $0x20] sm:$0xff]   ;;  %v1081_v22 = vld [vmem:[%s1423_s1 + $0x28] sm:$0xff]  }
   0x8   :  { %955 = vmatpush3.bf16.msra.mxu0 %v1065_v6  ;;  %v1074_v15 = vld [vmem:[%s1423_s1 + $0x98] sm:$0xff]   ;;  %v1078_v19 = vld [vmem:[%s1423_s1 + $0xa0] sm:$0xff]   ;;  %v1082_v23 = vld [vmem:[%s1423_s1 + $0xa8] sm:$0xff]  }
   0x9   :  { %977 = vmatpush3.bf16.msra.mxu1 %v1066_v7  ;;  %956 = vmatprep.subr.bf16.mxu0 %v1067_v8  ;;  %v1083_v24 = vld [vmem:[%s1423_s1 + $0x70] sm:$0xff]   ;;  %v1087_v29 = vld [vmem:[%s1423_s1 + $0x78] sm:$0xff]   ;;  %v157_v34 = vld [vmem:[%s1422_s0] sm:$0xff] }
   0xa   :  { %978 = vmatprep.subr.bf16.mxu1 %v1068_v9  ;;  %v1084_v25 = vld [vmem:[%s1423_s1 + $0xf0] sm:$0xff]   ;;  %v1088_v30 = vld [vmem:[%s1423_s1 + $0xf8] sm:$0xff]   ;;  %v1092_v35 = vld [vmem:[%s1423_s1 + $0x140] sm:$0xff]   ;;  %v161_v40 = vcombine.high %v157_v34, %v157_v34  ;;  %v168_v42 = vrot.slane %v157_v34, %v1295_v41 }
   0xb   :  { %v1085_v26 = vld [vmem:[%s1423_s1 + $0x30] sm:$0xff]   ;;  %v1089_v31 = vld [vmem:[%s1423_s1 + $0x38] sm:$0xff]   ;;  %v1093_v38 = vld [vmem:[%s1423_s1 + $0x1c0] sm:$0xff]  }
   0xc   :  { %957 = vmatpush3.bf16.msra.mxu0 %v1069_v10  ;;  %v1086_v27 = vld [vmem:[%s1423_s1 + $0xb0] sm:$0xff]   ;;  %v1090_v32 = vld [vmem:[%s1423_s1 + $0xb8] sm:$0xff]   ;;  %v175_v43 = vrot.slane %v161_v40, %v1295_v41  ;;  %v176_v44 = vcombine.high %v168_v42, %v168_v42  ;;  %v1094_v46 = vld [vmem:[%s1423_s1 + $0x100] sm:$0xff]   ;;  %v203_v47 = vpack.c.bf16 %v168_v42, %v168_v42 }
   0xd   :  { %979 = vmatpush3.bf16.msra.mxu1 %v1070_v11  ;;  %958 = vmatprep.subr.bf16.mxu0 %v1071_v12  ;;  %v1095_v49 = vld [vmem:[%s1423_s1 + $0x180] sm:$0xff]   ;;  %v1096_v52 = vld [vmem:[%s1423_s1 + $0x148] sm:$0xff]   ;;  %v1100_v56 = vld [vmem:[%s1423_s1 + $0x150] sm:$0xff]  }
   0xe   :  { %980 = vmatprep.subr.bf16.mxu1 %v1072_v13  ;;  %v177_v45 = vcombine.high %v175_v43, %v175_v43  ;;  %v205_v48 = vpack.c.bf16 %v175_v43, %v175_v43  ;;  %v204_v50 = vpack.c.bf16 %v176_v44, %v176_v44  ;;  %v1097_v53 = vld [vmem:[%s1423_s1 + $0x1c8] sm:$0xff]   ;;  %v1101_v57 = vld [vmem:[%s1423_s1 + $0x1d0] sm:$0xff]   ;;  %v1104_v60 = vld [vmem:[%s1423_s1 + $0x158] sm:$0xff]  }
   0xf   :  { %v1098_v54 = vld [vmem:[%s1423_s1 + $0x108] sm:$0xff]   ;;  %v1102_v58 = vld [vmem:[%s1423_s1 + $0x110] sm:$0xff]   ;;  %v1105_v61 = vld [vmem:[%s1423_s1 + $0x1d8] sm:$0xff]  }
  0x10   :  { %959 = vmatpush3.bf16.msra.mxu0 %v1073_v14  ;;  %v206_v51 = vpack.c.bf16 %v177_v45, %v177_v45  ;;  %627 = vmatprep.mubr.bf16.mxu0 %v204_v50  ;;  %v1099_v55 = vld [vmem:[%s1423_s1 + $0x188] sm:$0xff]   ;;  %v1103_v59 = vld [vmem:[%s1423_s1 + $0x190] sm:$0xff]   ;;  %v1106_v62 = vld [vmem:[%s1423_s1 + $0x118] sm:$0xff]  }
  0x11   :  { %981 = vmatpush3.bf16.msra.mxu1 %v1074_v15  ;;  %960 = vmatprep.subr.bf16.mxu0 %v1075_v16  ;;  %v1107_v63 = vld [vmem:[%s1423_s1 + $0x198] sm:$0xff]   ;;  %v1108_v0 = vld [vmem:[%s1423_s1 + $0x160] sm:$0xff]   ;;  %v1112_v4 = vld [vmem:[%s1423_s1 + $0x168] sm:$0xff]  }
  0x12   :  { %982 = vmatprep.subr.bf16.mxu1 %v1076_v17  ;;  %667 = vmatprep.mubr.bf16.mxu1 %v206_v51  ;;  %v1109_v1 = vld [vmem:[%s1423_s1 + $0x1e0] sm:$0xff]   ;;  %v1113_v5 = vld [vmem:[%s1423_s1 + $0x1e8] sm:$0xff]   ;;  %v1116_v8 = vld [vmem:[%s1423_s1 + $0x170] sm:$0xff]  }
  0x13   :  { %v1110_v2 = vld [vmem:[%s1423_s1 + $0x120] sm:$0xff]   ;;  %v1114_v6 = vld [vmem:[%s1423_s1 + $0x128] sm:$0xff]   ;;  %v1117_v9 = vld [vmem:[%s1423_s1 + $0x1f0] sm:$0xff]  }
  0x14   :  { %961 = vmatpush3.bf16.msra.mxu0 %v1077_v18  ;;  %v1111_v3 = vld [vmem:[%s1423_s1 + $0x1a0] sm:$0xff]   ;;  %v1115_v7 = vld [vmem:[%s1423_s1 + $0x1a8] sm:$0xff]  }
  0x15   :  { %983 = vmatpush3.bf16.msra.mxu1 %v1078_v19  ;;  %962 = vmatprep.subr.bf16.mxu0 %v1079_v20  ;;  %v158_v10 = vld [vmem:[%s1422_s0 + $0x8] sm:$0xff] }
  0x16   :  { %984 = vmatprep.subr.bf16.mxu1 %v1080_v21 }
  0x18   :  { %963 = vmatpush3.bf16.msra.mxu0 %v1081_v22 }
  0x19   :  { %985 = vmatpush3.bf16.msra.mxu1 %v1082_v23  ;;  %964 = vmatprep.subr.bf16.mxu0 %v1083_v24 }
  0x1a   :  { %986 = vmatprep.subr.bf16.mxu1 %v1084_v25 }
  0x1c   :  { %965 = vmatpush3.bf16.msra.mxu0 %v1085_v26 }
  0x1d   :  { %987 = vmatpush3.bf16.msra.mxu1 %v1086_v27  ;;  %966 = vmatprep.subr.bf16.mxu0 %v1087_v29 }
  0x1e   :  { %988 = vmatprep.subr.bf16.mxu1 %v1088_v30 }
  0x20   :  { %967 = vmatpush3.bf16.msra.mxu0 %v1089_v31 }
  0x21   :  { %989 = vmatpush3.bf16.msra.mxu1 %v1090_v32  ;;  %996 = vmatprep.subr.bf16.mxu0 %v1092_v35 }
  0x22   :  { %1018 = vmatprep.subr.bf16.mxu1 %v1093_v38 }
  0x23   :  { %628 = vmatmul.mubr.bf16.vlgmr.msra.gmra.mrb[0].mxu0 %v203_v47 }
  0x24   :  { %668 = vmatmul.mubr.bf16.vlgmr.msra.gmra.mrb[0].mxu1 %v205_v48  ;;  %997 = vmatpush3.bf16.msra.mxu0 %v1094_v46 }
  0x25   :  { %1019 = vmatpush3.bf16.msra.mxu1 %v1095_v49  ;;  %998 = vmatprep.subr.bf16.mxu0 %v1096_v52 }
  0x26   :  { %1020 = vmatprep.subr.bf16.mxu1 %v1097_v53 }
  0x28   :  { %999 = vmatpush3.bf16.msra.mxu0 %v1098_v54 }
  0x29   :  { %1021 = vmatpush3.bf16.msra.mxu1 %v1099_v55  ;;  %1000 = vmatprep.subr.bf16.mxu0 %v1100_v56 }
  0x2a   :  { %1022 = vmatprep.subr.bf16.mxu1 %v1101_v57 }
  0x2c   :  { %1001 = vmatpush3.bf16.msra.mxu0 %v1102_v58 }
  0x2d   :  { %1023 = vmatpush3.bf16.msra.mxu1 %v1103_v59  ;;  %1002 = vmatprep.subr.bf16.mxu0 %v1104_v60 }
  0x2e   :  { %1024 = vmatprep.subr.bf16.mxu1 %v1105_v61 }
  0x30   :  { %1003 = vmatpush3.bf16.msra.mxu0 %v1106_v62 }
  0x31   :  { %1025 = vmatpush3.bf16.msra.mxu1 %v1107_v63  ;;  %1004 = vmatprep.subr.bf16.mxu0 %v1108_v0 }
  0x32   :  { %1026 = vmatprep.subr.bf16.mxu1 %v1109_v1 }
  0x34   :  { %1005 = vmatpush3.bf16.msra.mxu0 %v1110_v2 }
  0x35   :  { %1027 = vmatpush3.bf16.msra.mxu1 %v1111_v3  ;;  %1006 = vmatprep.subr.bf16.mxu0 %v1112_v4 }
  0x36   :  { %1028 = vmatprep.subr.bf16.mxu1 %v1113_v5 }
  0x37   :  { %10 = vsyncpa [#allocation4], 0  ;;  %v185_v11 = vrot.slane %v158_v10, %v1295_v41  ;;  %v178_v12 = vcombine.high %v158_v10, %v158_v10  ;;  %v1118_v13 = vld [vmem:[%s1423_s1 + $0x130] sm:$0xff]   ;;  %v1120_v17 = vld [vmem:[%s1423_s1 + $0x178] sm:$0xff]   ;;  %vm26_vm0 = vcmask 123904   ;;  %v1154_v26 = vmov 0.0  }
  0x38   :  { %1007 = vmatpush3.bf16.msra.mxu0 %v1114_v6  ;;  %v1119_v14 = vld [vmem:[%s1423_s1 + $0x1b0] sm:$0xff]   ;;  %v1121_v18 = vld [vmem:[%s1423_s1 + $0x1f8] sm:$0xff]   ;;  %27 = vst.msk [vmem:[#allocation2] sm:$0x3] %vm26_vm0, %v1154_v26  ;;  %v780_v27 = vld [vmem:[%s1425_s3] sm:$0xff]  ;;  %v1155_v30 = vmov 0.0|0.0  }
  0x39   :  { %1029 = vmatpush3.bf16.msra.mxu1 %v1115_v7  ;;  %v193_v15 = vcombine.high %v185_v11, %v185_v11  ;;  %v192_v16 = vrot.slane %v178_v12, %v1295_v41  ;;  %1008 = vmatprep.subr.bf16.mxu0 %v1116_v8  ;;  %v1122_v21 = vld [vmem:[%s1423_s1 + $0x138] sm:$0xff]   ;;  %v207_v24 = vpack.c.bf16 %v185_v11, %v185_v11  ;;  %v781_v29 = vld [vmem:[%s1425_s3 + $0x8] sm:$0xff]  ;;  %vm1156_vm1 = vmmov 0   ;;  %v948_v57 = vld [vmem:[%s1424_s2] ss:$0 sm:$0xff]  ;;  %s1157_s2 = smov 16  }
  0x3a   :  { %1030 = vmatprep.subr.bf16.mxu1 %v1117_v9  ;;  %v1123_v22 = vld [vmem:[%s1423_s1 + $0x1b8] sm:$0xff]   ;;  %v1051_v31 = vpack.c.bf16 %v781_v29, %v780_v27  ;;  %v771_v63 = vand.u32 127, %v165_v28  ;;  %vm789_vm3 = vcmask 130048   ;;  %v950_v2 = vld [vmem:[%s1426_s4] ss:$0 sm:$0xff]  ;;  %s1158_s30 = smov [#allocation3]  }
  0x3b   :  { %v208_v19 = vpack.c.bf16 %v193_v15, %v193_v15  ;;  %v194_v20 = vcombine.high %v192_v16, %v192_v16  ;;  %v209_v25 = vpack.c.bf16 %v192_v16, %v192_v16  ;;  %s876_s6 = sshll.u32 %s1158_s30, 4  ;;  %vm868_vm4 = vcmask 156800   ;;  %s877_s6 = int_to_ptr.vmem [resolvable:$true] %s876_s6 }
  0x3c   :  { %1009 = vmatpush3.bf16.msra.mxu0 %v1118_v13  ;;  %vm772_vm2 = vcmp.lt.s32.totalorder %v771_v63, 8  ;;  %s1129_s7 = scalar_lea.vmem %s877_s6, 32  ;;  %p1134_p1 = scmp.lt.s32.totalorder %s877_s6, %s877_s6 }
  0x3d   :  { %1031 = vmatpush3.bf16.msra.mxu1 %v1119_v14  ;;  %v210_v23 = vpack.c.bf16 %v194_v20, %v194_v20  ;;  %1010 = vmatprep.subr.bf16.mxu0 %v1120_v17  ;;  %p1130_p0 = scmp.ne.s32.totalorder %s877_s6, %s1129_s7  ;;  %p1135_p2 = scmp.lt.s32.totalorder %s1129_s7, %s1129_s7 }
  0x3e   :  { %1032 = vmatprep.subr.bf16.mxu1 %v1121_v18  ;;  %707 = vmatprep.mubr.bf16.mxu0 %v208_v19 }
  0x3f   :  { %747 = vmatprep.mubr.bf16.mxu1 %v210_v23  ;;  %v156_v54 = vld [vmem:[#allocation2] sm:$0x3]  ;;  %p1136_p3 = por %p1135_p2, %p1134_p1 }
  0x40   :  { %1011 = vmatpush3.bf16.msra.mxu0 %v1122_v21 }
  0x41   :  { %1033 = vmatpush3.bf16.msra.mxu1 %v1123_v22  ;;  %1050 = vmatprep.subr.bf16.mxu0 %v1155_v30  ;;  %p1137_p4 = pnand %p1136_p3, %p1130_p0 }
  0x43   :  { %708 = vmatmul.mubr.bf16.vlgmr.msra.gmra.mrb[4].mxu0 %v207_v24 }
  0x44   :  { %748 = vmatmul.mubr.bf16.vlgmr.msra.gmra.mrb[4].mxu1 %v209_v25  ;;  %1052 = vmatpush3.bf16.msra.mxu0 %v1051_v31 }
  0x45   :  { %1047 = vmatprep.mubr.msk.f32.mxu0 %vm1156_vm1, %v1154_v26 }
  0xf6   :  { %v968_v32 = vpop.f32.mrb[0].mxu0 }
  0xf7   :  { %v990_v33 = vpop.f32.mrb[0].mxu1  ;;  %v969_v34 = vpop.f32.mrb[1].mxu0 }
  0xf8   :  { %v991_v35 = vpop.f32.mrb[1].mxu1  ;;  %v970_v36 = vadd.f32 %v969_v34, %v968_v32  ;;  %v971_v38 = vpop.f32.mrb[2].mxu0 }
  0xf9   :  { %v992_v37 = vadd.f32 %v991_v35, %v990_v33  ;;  %v993_v39 = vpop.f32.mrb[2].mxu1  ;;  %v972_v40 = vpop.f32.mrb[3].mxu0 }
  0xfa   :  { %v994_v41 = vpop.f32.mrb[3].mxu1 }
  0xfb   :  { %v670_v42 = vadd.f32 %v992_v37, %v970_v36 }
 0x116   :  { %v1012_v43 = vpop.f32.mrb[4].mxu0 }
 0x117   :  { %v1034_v44 = vpop.f32.mrb[4].mxu1  ;;  %v1013_v45 = vpop.f32.mrb[5].mxu0 }
 0x118   :  { %v1035_v46 = vpop.f32.mrb[5].mxu1  ;;  %v1014_v47 = vadd.f32 %v1013_v45, %v1012_v43  ;;  %v1015_v49 = vpop.f32.mrb[6].mxu0 }
 0x119   :  { %v1036_v48 = vadd.f32 %v1035_v46, %v1034_v44  ;;  %v1037_v50 = vpop.f32.mrb[6].mxu1  ;;  %v1016_v51 = vpop.f32.mrb[7].mxu0 }
 0x11a   :  { %v1038_v52 = vpop.f32.mrb[7].mxu1  ;;  %v710_v53 = vadd.f32 %v1014_v47, %v670_v42 }
 0x11c   :  { %v750_v55 = vadd.f32 %v1036_v48, %v710_v53 }
 0x11e   :  { %v755_v56 = vadd.f32 %v750_v55, %v156_v54 }
 0x120   :  { %757 = vst.msk [vmem:[#allocation2] sm:$0x3] %vm26_vm0, %v755_v56 }
 0x127   :  { %v761_v58 = vld [vmem:[#allocation2] sm:$0x3] }
 0x128   :  { %v769_v59 = vadd.f32 %v948_v57, %v761_v58 }
 0x12a   :  { %v949_v60 = vmul.f32 -1.442695, %v769_v59 }
 0x12c   :  { %1125 = vpow2.f32 %v949_v60 }
 0x136   :  { %v1126_v61 = vpop.eup %1125 }
 0x137   :  { %v776_v62 = vadd.f32 1.0, %v1126_v61 }
 0x139   :  { %1127 = vrcp.f32 %v776_v62 }
 0x143   :  { %v1128_v0 = vpop.eup %1127 }
 0x144   :  { %v779_v1 = vsel %vm772_vm2, %v1128_v0, %v769_v59 }
 0x145   :  { %1048 = vmatmul.mubr.msk.f32.vlgmr.msra.gmra.mrb[8].mxu0 %vm789_vm3, %v779_v1  ;;  %863 = vst.msk [vmem:[#allocation3] sm:$0x3] %vm26_vm0, %v779_v1 }
 0x218   :  { %v859_v3 = vpop.f32.mrb[8].mxu0 }
 0x219   :  { %v860_v4 = vadd.f32 %v950_v2, %v859_v3  ;;  %v1049_v5 = vpop.f32.mrb[9].mxu0 }
 0x21b   :  { %865 = vrot.lane.b32.xlu0 %v860_v4, %s1157_s2 }
 0x28d   :  { %v866_v28 = vpop.permute.xlu0 %865 }
 0x28e   :  { %869 = vst.msk [vmem:[#allocation3] sm:$0x3] %vm868_vm4, %v866_v28 }
 0x28f   :  { %1140 = shalt.err (!%p1137_p4)
}
 0x290   :  { %s1141_s9 = scalar_lea.hbm %s1427_s5, 32 }
 0x291   :  { %p1142_p5 = scmp.ne.s32.totalorder %s1427_s5, %s1141_s9  ;;  %p1145_p6 = scmp.lt.u32.totalorder %s1141_s9, %s1427_s5 }
 0x293   :  { %p1147_p7 = pnand %p1145_p6, %p1142_p5 }
 0x295   :  { %1150 = shalt.err (!%p1147_p7)
}
 0x296   :  { %879 = dma.vmem_to_hbm [thread:$0]  %s877_s6, 32, %s1427_s5, [#allocation4]  }
 0x297   :  { %1151 = dma.done.wait [#allocation4], 32  }
 0x298   :  { %1152 = vsyncadd [#allocation4], 4294967264 }
 0x299   :  { %883 = vsyncpa [#allocation4], 1 }

</bundles_post_ra>
